<compile_context>
chip_gen: v7x
topology: tpu7x:2x2x1
jax: 0.10.0
libtpu: 0.0.40
codegen_flags: <defaults>
</compile_context>

<pallas_src>
import functools

import jax
import jax.numpy as jnp
import numpy as np
from jax.experimental import pallas as pl
from jax.experimental.pallas import tpu as pltpu

EPS = 1e-5            # eps used by calc_mean_std / nor_mean_std in ASEPA
MAX_SAMPLE = 256 * 256


def _physical_vmem_bytes():
    """Per-core VMEM capacity; falls back to the v7x floor (64 MiB)."""
    try:
        info = pltpu.get_tpu_info()
        for attr in ("vmem_capacity_bytes", "vmem_size_bytes", "vmem_bytes"):
            v = getattr(info, attr, None)
            if v:
                return int(v)
    except Exception:
        pass
    return 64 * 1024 * 1024


def _pick_tile(n, cap):
    """Largest multiple of 128 that divides n and is <= max(cap, 128).
    If n is not a multiple of 128, fall back to the full extent (one block)."""
    if n % 128 != 0:
        # TODO(synk): pad odd spatial sizes to a multiple of 128 (with -inf
        # masking of padded style pixels in the softmax) so they stay tiled and
        # lane-dense; for now they collapse to one full-extent block.
        return n
    t = (min(max(cap, 128), n) // 128) * 128
    while n % t != 0:
        t -= 128
    return t


# ---------------------------------------------------------------------------
# Stage 1: g / h 1x1 projections, computed once per style pixel.
# ---------------------------------------------------------------------------
def _proj_kv_kernel(sk_ref, st_ref, wg_ref, bg_ref, wh_ref, bh_ref,
                    gm_ref, hm_ref, hm2_ref):
    sk = sk_ref[0]                                               # (Ck,  TS) channels-first
    st = st_ref[0]                                               # (TS, Cin) pixels-major
    # Gm stays channels-first (K on sublanes, Ns on lanes): it is consumed as
    # the (K, N) operand of the logits matmul with no transpose.
    gm = jnp.dot(wg_ref[...], sk,
                 preferred_element_type=jnp.float32) + bg_ref[...]   # (Ck, TS)
    # Hm is emitted pixels-major (Ns, Cout) so stage 2's attention-weighted
    # moments are natural (M,K)x(K,N) dots (no transpose of the big S tile).
    hm = jnp.dot(st, wh_ref[...],
                 preferred_element_type=jnp.float32) + bh_ref[...]   # (TS, Cout)
    gm_ref[0] = gm.astype(gm_ref.dtype)
    hm_ref[0] = hm.astype(hm_ref.dtype)
    # Second moment kept in f32 regardless of mxu_dtype: the E[x^2] - E[x]^2
    # cancellation in std is too fragile for bf16 storage.
    hm2_ref[0] = (hm * hm).astype(hm2_ref.dtype)


# ---------------------------------------------------------------------------
# Stage 2: per query tile -> f projection, softmax attention, AdaIN combine.
# ---------------------------------------------------------------------------
def _attn_kernel(ck_ref, gm_ref, hm_ref, hm2_ref, ct_ref, cs_ref, wf_ref, bf_ref,
                 *out_refs, mxu_dtype, s_dtype, emit_s):
    if emit_s:
        out_ref, s_ref = out_refs
    else:
        (out_ref,) = out_refs

    ck = ck_ref[0]                        # (TQ, Cq)
    gm = gm_ref[0]                        # (Ck, Ns)    mxu_dtype, per-batch resident
    hm = hm_ref[0]                        # (Ns, Cout)  mxu_dtype, per-batch resident
    hm2 = hm2_ref[0]                      # (Ns, Cout)  f32,       per-batch resident
    ct = ct_ref[0]                        # (Cin, TQ)   channels-first content tile
    cs = cs_ref[0]                        # (Cin, 2)    per-batch content stats

    # f 1x1 conv for this query tile only (not redundant across tiles).
    fm = jnp.dot(ck, wf_ref[...],
                 preferred_element_type=jnp.float32) + bf_ref[...]   # (TQ, Ck)

    # logits (TQ, Ns): natural (M,K)x(K,N); Gm already stored in MXU dtype.
    logits = jnp.dot(fm.astype(mxu_dtype), gm,
                     preferred_element_type=jnp.float32)
    logits = logits - jnp.max(logits, axis=-1, keepdims=True)
    e = jnp.exp(logits)
    # exact reciprocal keeps S faithful to the reference softmax
    s = e * pl.reciprocal(jnp.sum(e, axis=-1, keepdims=True), approx=False)

    s_m = s.astype(mxu_dtype)
    if emit_s:
        # Single cast reused for store + matmul when s_dtype == mxu_dtype.
        if jnp.dtype(s_dtype) == jnp.dtype(mxu_dtype):
            s_ref[0] = s_m
        else:
            s_ref[0] = s.astype(s_dtype)

    # Attention-weighted first / second moments: both dots contract the shared
    # Ns axis in natural form (Hm / Hm^2 are (Ns, Cout)).  Second moment dot is
    # full f32 for a stable std.
    mean_t = jnp.dot(s_m, hm, preferred_element_type=jnp.float32)    # (TQ, Cout)
    sec_t = jnp.dot(s, hm2, preferred_element_type=jnp.float32)      # (TQ, Cout)
    std_t = jnp.sqrt(jnp.maximum(sec_t - mean_t * mean_t, 0.0))      # torch.relu clamp

    # nor_mean_std(content): per-(batch, channel) stats precomputed in wrapper.
    cmean = cs[:, 0:1]                                               # (Cin, 1)
    rsig = cs[:, 1:2]                                                # (Cin, 1)
    norm = (ct - cmean) * rsig                                       # (Cin, TQ)

    # Only the small (TQ, Cout) moments get transposed (~Ns/Cout cheaper than
    # transposing S); the store stays lane-dense channels-first == NCHW.
    out_ref[0] = (jnp.transpose(std_t) * norm
                  + jnp.transpose(mean_t)).astype(out_ref.dtype)


def asepa_forward(content, style, content_key, style_key, params,
                  mxu_dtype=jnp.bfloat16, s_dtype=jnp.float32,
                  return_attention=True):
    """NCHW inputs -> Pallas kernels (channels-first output) -> (out, S).

    mxu_dtype: operand dtype of the three big matmuls (f32 accumulation).
               bf16 default = 2-4x MXU throughput and half the resident VMEM /
               inter-stage HBM traffic; use jnp.float32 for bit-faithful parity
               with the f32 PyTorch module.
    s_dtype:   storage dtype of the returned attention map S.
    return_attention=False skips materializing S (its (B, Nc, Ns) write is the
               dominant HBM stream) and returns (out, None).
    """
    Wf, bf, Wg, bg, Wh, bh = params            # weights stored as (Cin, Cout)
    B, Cin, H, W = content.shape
    _, Cq, Hk, Wk = content_key.shape
    _, Ck, Hg, Wg_sp = style_key.shape
    _, _, Hs, Ws = style.shape
    Cout = Wh.shape[1]

    assert (Hk, Wk) == (H, W), "content_key spatial must match content spatial"
    # torch bicubic interpolate of H(style) to the style_key resolution is an
    # exact identity when the resolutions already match.
    assert (Hs, Ws) == (Hg, Wg_sp)
    # TODO(synk): torch-style bicubic (a=-0.75) resize for (Hs, Ws) != (Hg, Wg).
    assert Cin == Cout, "residual combine requires in_planes == out_planes"

    Nc = H * W
    Ns = Hg * Wg_sp
    assert Ns <= MAX_SAMPLE
    # TODO(synk): torch.randperm sub-sampling branch (h_g*w_g > max_sample).

    # ---- layout plumbing -----------------------------------------------------
    # content / style_key are consumed as free NCHW reshapes (channels-first);
    # content_key and style get one small XLA transpose each so every in-kernel
    # matmul is in natural (M,K)x(K,N) form (no transposes of big tiles).
    ct_cf = content.reshape(B, Cin, Nc)                                   # free
    sk_cf = style_key.reshape(B, Ck, Ns)                                  # free
    ck_nl = jnp.transpose(content_key, (0, 2, 3, 1)).reshape(B, Nc, Cq)
    st_nl = jnp.transpose(style, (0, 2, 3, 1)).reshape(B, Ns, Cin)

    Wg_oi = Wg.T                      # (Ck_out, Ck_in) for channels-first Gm
    bg_col = bg.reshape(-1, 1)
    bh_row = bh.reshape(1, -1)
    bf_row = bf.reshape(1, -1)

    # per-batch per-channel content statistics (tiny memory-bound reduction,
    # hoisted out of the hot loop).
    cmean = jnp.mean(ct_cf, axis=-1, keepdims=True)                       # (B, Cin, 1)
    cvar = jnp.var(ct_cf, axis=-1, ddof=1, keepdims=True) + EPS           # unbiased
    cstats = jnp.concatenate([cmean, jax.lax.rsqrt(cvar)], axis=-1)       # (B, Cin, 2)

    # ---- VMEM model & tile selection ------------------------------------------
    mb = jnp.dtype(mxu_dtype).itemsize
    sb = jnp.dtype(s_dtype).itemsize
    vmem_cap = _physical_vmem_bytes()
    vmem_budget = min(int(vmem_cap * 0.85), vmem_cap - (8 << 20))   # headroom

    # Stage 1: everything scales with TS (double-buffered ins + outs).
    s1_per_ts = 2 * ((Ck + Cin) * 4 + Ck * mb + Cout * mb + Cout * 4)
    s1_fixed = (Ck * Ck + Ck + Cin * Cout + Cout) * 4
    TS = _pick_tile(Ns, min(8192, max(128, (vmem_budget - s1_fixed) // s1_per_ts)))
    s1_limit = int(min(vmem_budget,
                       max(32 << 20, s1_fixed + TS * s1_per_ts + (4 << 20))))

    # Stage 2: per-batch residents (double-buffered by the pipeline) ...
    s2_fixed = (2 * Ns * (Ck * mb + Cout * mb + Cout * 4)
                + (Cq * Ck + Ck) * 4 + 2 * Cin * 2 * 4)
    # ... plus everything that scales with TQ: softmax temporaries (logits /
    # exp / normalized, all f32) + the MXU-cast copy + the double-buffered S
    # output block + the small per-query blocks.  This is the ~5x (TQ, Ns)
    # multiplier the old one-copy heuristic missed.
    s2_per_q = (Ns * (3 * 4 + mb)
                + (2 * Ns * sb if return_attention else 0)
                + 2 * (Cq + Cin + Cout) * 4
                + (5 * Cout + Cin) * 4)
    avail = vmem_budget - s2_fixed
    # TODO(synk): when the residents alone exceed the budget (very large Ns on
    # v7x's 64 MiB VMEM), stream over Ns with an online-softmax "arbitrary"
    # grid axis instead of shrinking TQ below 128.
    tq_cap = max(1, avail // s2_per_q) if avail > 0 else 1
    TQ = _pick_tile(Nc, tq_cap)
    # Megacore balance: make sure v7x's two TensorCores both get grid points.
    if B * (Nc // TQ) < 2 and Nc % 256 == 0:
        TQ = _pick_tile(Nc, Nc // 2)
    s2_limit = int(min(vmem_budget,
                       max(32 << 20, s2_fixed + TQ * s2_per_q + (4 << 20))))
    # TODO(synk): pipeline_mode=pl.Buffered(1) on the gm/hm/hm2 residents would
    # halve s2_fixed (they only change at batch boundaries) at the cost of one
    # exposed DMA per batch — worth it on v7x for very large Ns.

    # ---- stage 1: g / h projections, computed once per style pixel ------------
    gm, hm, hm2 = pl.pallas_call(
        _proj_kv_kernel,
        out_shape=(jax.ShapeDtypeStruct((B, Ck, Ns), mxu_dtype),
                   jax.ShapeDtypeStruct((B, Ns, Cout), mxu_dtype),
                   jax.ShapeDtypeStruct((B, Ns, Cout), jnp.float32)),
        grid=(B, Ns // TS),
        in_specs=[
            pl.BlockSpec((1, Ck, TS), lambda b, s: (b, 0, s)),
            pl.BlockSpec((1, TS, Cin), lambda b, s: (b, s, 0)),
            pl.BlockSpec((Ck, Ck), lambda b, s: (0, 0)),
            pl.BlockSpec((Ck, 1), lambda b, s: (0, 0)),
            pl.BlockSpec((Cin, Cout), lambda b, s: (0, 0)),
            pl.BlockSpec((1, Cout), lambda b, s: (0, 0)),
        ],
        out_specs=(pl.BlockSpec((1, Ck, TS), lambda b, s: (b, 0, s)),
                   pl.BlockSpec((1, TS, Cout), lambda b, s: (b, s, 0)),
                   pl.BlockSpec((1, TS, Cout), lambda b, s: (b, s, 0))),
        compiler_params=pltpu.CompilerParams(
            dimension_semantics=("parallel", "parallel"),
            vmem_limit_bytes=s1_limit),
    )(sk_cf, st_nl, Wg_oi, bg_col, Wh, bh_row)

    # ---- stage 2: attention + AdaIN combine, tiled over query pixels ----------
    attn_kernel = functools.partial(_attn_kernel, mxu_dtype=mxu_dtype,
                                    s_dtype=s_dtype, emit_s=return_attention)
    in_specs = [
        pl.BlockSpec((1, TQ, Cq), lambda b, q: (b, q, 0)),        # content_key tile
        pl.BlockSpec((1, Ck, Ns), lambda b, q: (b, 0, 0)),        # Gm   (per-batch resident)
        pl.BlockSpec((1, Ns, Cout), lambda b, q: (b, 0, 0)),      # Hm   (resident)
        pl.BlockSpec((1, Ns, Cout), lambda b, q: (b, 0, 0)),      # Hm^2 (resident, f32)
        pl.BlockSpec((1, Cin, TQ), lambda b, q: (b, 0, q)),       # content tile
        pl.BlockSpec((1, Cin, 2), lambda b, q: (b, 0, 0)),        # content stats
        pl.BlockSpec((Cq, Ck), lambda b, q: (0, 0)),              # Wf
        pl.BlockSpec((1, Ck), lambda b, q: (0, 0)),               # bf
    ]
    out_spec_o = pl.BlockSpec((1, Cout, TQ), lambda b, q: (b, 0, q))
    cparams = pltpu.CompilerParams(
        dimension_semantics=("parallel", "parallel"),
        vmem_limit_bytes=s2_limit)

    if return_attention:
        out_cf, S = pl.pallas_call(
            attn_kernel,
            out_shape=(jax.ShapeDtypeStruct((B, Cout, Nc), jnp.float32),
                       jax.ShapeDtypeStruct((B, Nc, Ns), s_dtype)),
            grid=(B, Nc // TQ),
            in_specs=in_specs,
            out_specs=(out_spec_o,
                       pl.BlockSpec((1, TQ, Ns), lambda b, q: (b, q, 0))),
            compiler_params=cparams,
        )(ck_nl, gm, hm, hm2, ct_cf, cstats, Wf, bf_row)
    else:
        out_cf = pl.pallas_call(
            attn_kernel,
            out_shape=jax.ShapeDtypeStruct((B, Cout, Nc), jnp.float32),
            grid=(B, Nc // TQ),
            in_specs=in_specs,
            out_specs=out_spec_o,
            compiler_params=cparams,
        )(ck_nl, gm, hm, hm2, ct_cf, cstats, Wf, bf_row)
        S = None

    out = out_cf.reshape(B, Cout, H, W)       # channels-first == NCHW: free
    return out, S


def reference_forward(content, style, content_key, style_key, params):
    """Plain-JAX NCHW reference mirroring the PyTorch module exactly."""
    Wf, bf, Wg, bg, Wh, bh = params

    def conv1x1(x, Wm, b):
        return jnp.einsum('bihw,io->bohw', x, Wm) + b.reshape(1, -1, 1, 1)

    Fm = conv1x1(content_key, Wf, bf)
    Gm = conv1x1(style_key, Wg, bg)
    Hm = conv1x1(style, Wh, bh)
    b_, _, hg, wg = Gm.shape
    Gf = Gm.reshape(b_, -1, hg * wg)
    _, _, h, w = Fm.shape
    Ff = jnp.transpose(Fm.reshape(b_, -1, h * w), (0, 2, 1))
    S = jax.nn.softmax(jnp.einsum('bnc,bcm->bnm', Ff, Gf), axis=-1)
    # bicubic interpolate to (hg, wg) is identity since shapes match
    style_flat = jnp.transpose(Hm.reshape(b_, -1, hg * wg), (0, 2, 1))
    mean = jnp.einsum('bnm,bmc->bnc', S, style_flat)
    std = jnp.sqrt(jnp.maximum(
        jnp.einsum('bnm,bmc->bnc', S, style_flat ** 2) - mean ** 2, 0.0))
    mean = jnp.transpose(mean.reshape(b_, h, w, -1), (0, 3, 1, 2))
    std = jnp.transpose(std.reshape(b_, h, w, -1), (0, 3, 1, 2))
    B, C, H, W = content.shape
    cf = content.reshape(B, C, -1)
    cm = cf.mean(-1).reshape(B, C, 1, 1)
    cv = cf.var(-1, ddof=1).reshape(B, C, 1, 1) + EPS
    norm = (content - cm) / jnp.sqrt(cv)
    return std * norm + mean, S


if __name__ == "__main__":
    # Module config: in_planes == out_planes (required by the residual combine),
    # query_planes / key_planes for the f/g projections.
    B = 2
    in_planes = out_planes = 32
    query_planes = 16
    key_planes = 32
    H = W = 8          # content / content_key spatial  -> Nc = 64
    Hg = Wg_sp = 8     # style / style_key spatial      -> Ns = 64

    key = jax.random.PRNGKey(0)
    keys = jax.random.split(key, 10)

    content = jax.random.normal(keys[0], (B, in_planes, H, W), jnp.float32)
    style = jax.random.normal(keys[1], (B, in_planes, Hg, Wg_sp), jnp.float32)
    content_key = jax.random.normal(keys[2], (B, query_planes, H, W), jnp.float32)
    style_key = jax.random.normal(keys[3], (B, key_planes, Hg, Wg_sp), jnp.float32)

    # Deterministic synthetic parameters for the 1x1 convs (stored as (Cin, Cout)).
    Wf = jax.random.normal(keys[4], (query_planes, key_planes), jnp.float32) * 0.1
    bf = jax.random.normal(keys[5], (key_planes,), jnp.float32) * 0.05
    Wg = jax.random.normal(keys[6], (key_planes, key_planes), jnp.float32) * 0.1
    bg = jax.random.normal(keys[7], (key_planes,), jnp.float32) * 0.05
    Wh = jax.random.normal(keys[8], (in_planes, out_planes), jnp.float32) * 0.1
    bh = jax.random.normal(keys[9], (out_planes,), jnp.float32) * 0.05
    # self.out_conv exists in __init__ but is unused in forward -> not materialized.
    params = (Wf, bf, Wg, bg, Wh, bh)

    ref_out, ref_S = reference_forward(content, style, content_key, style_key, params)

    # 1) f32 MXU path: bit-faithful to the PyTorch f32 module, tight tolerances.
    out32, S32 = asepa_forward(content, style, content_key, style_key, params,
                               mxu_dtype=jnp.float32, s_dtype=jnp.float32)
    jax.block_until_ready((out32, S32))
    np.testing.assert_allclose(np.asarray(out32), np.asarray(ref_out),
                               atol=5e-4, rtol=5e-4)
    np.testing.assert_allclose(np.asarray(S32), np.asarray(ref_S),
                               atol=5e-5, rtol=5e-5)

    # 2) default fast path: bf16 matmul operands (f32 accumulation, f32 second
    #    moment), looser tolerances.
    out_bf, S_bf = asepa_forward(content, style, content_key, style_key, params)
    jax.block_until_ready((out_bf, S_bf))
    np.testing.assert_allclose(np.asarray(out_bf), np.asarray(ref_out),
                               atol=5e-2, rtol=5e-2)
    np.testing.assert_allclose(np.asarray(S_bf), np.asarray(ref_S),
                               atol=1e-2, rtol=5e-2)

    # 3) no-S path (skips the dominant HBM write) must match the bf16 output.
    out_ns, S_ns = asepa_forward(content, style, content_key, style_key, params,
                                 return_attention=False)
    jax.block_until_ready(out_ns)
    assert S_ns is None
    np.testing.assert_allclose(np.asarray(out_ns), np.asarray(out_bf),
                               atol=1e-5, rtol=1e-5)

    print("KERNEL_OK")
</pallas_src>

<mosaic_0001>
module attributes {stable_mosaic.version = 11 : i64} {
  func.func @_proj_kv_kernel(%arg0: i32, %arg1: i32, %arg2: memref<1x32x64xf32, #tpu.memory_space<vmem>>, %arg3: memref<1x64x32xf32, #tpu.memory_space<vmem>>, %arg4: memref<32x32xf32, #tpu.memory_space<vmem>>, %arg5: memref<32x1xf32, #tpu.memory_space<vmem>>, %arg6: memref<32x32xf32, #tpu.memory_space<vmem>>, %arg7: memref<1x32xf32, #tpu.memory_space<vmem>>, %arg8: memref<1x32x64xf32, #tpu.memory_space<vmem>>, %arg9: memref<1x64x32xf32, #tpu.memory_space<vmem>>, %arg10: memref<1x64x32xf32, #tpu.memory_space<vmem>>) attributes {dimension_semantics = [#tpu.dimension_semantics<parallel>, #tpu.dimension_semantics<parallel>], iteration_bounds = array<i64: 2, 1>, scalar_prefetch = 0 : i64, scratch_operands = 0 : i64, tpu.core_type = #tpu.core_type<tc>, window_params = [{transform_indices = @transform_0, window_bounds = array<i64: 1, 32, 64>}, {transform_indices = @transform_1, window_bounds = array<i64: 1, 64, 32>}, {pipeline_mode = #tpu.pipeline_mode<synchronous>, transform_indices = @transform_2, window_bounds = array<i64: 32, 32>}, {pipeline_mode = #tpu.pipeline_mode<synchronous>, transform_indices = @transform_3, window_bounds = array<i64: 32, 1>}, {pipeline_mode = #tpu.pipeline_mode<synchronous>, transform_indices = @transform_4, window_bounds = array<i64: 32, 32>}, {pipeline_mode = #tpu.pipeline_mode<synchronous>, transform_indices = @transform_5, window_bounds = array<i64: 1, 32>}, {transform_indices = @transform_6, window_bounds = array<i64: 1, 32, 64>}, {transform_indices = @transform_7, window_bounds = array<i64: 1, 64, 32>}, {transform_indices = @transform_8, window_bounds = array<i64: 1, 64, 32>}]} {
    %c0 = arith.constant 0 : index
    %c0_0 = arith.constant 0 : index
    %c0_1 = arith.constant 0 : index
    %0 = vector.load %arg2[%c0, %c0_0, %c0_1] : memref<1x32x64xf32, #tpu.memory_space<vmem>>, vector<1x32x64xf32>
    %1 = vector.shape_cast %0 : vector<1x32x64xf32> to vector<32x64xf32>
    %c0_2 = arith.constant 0 : index
    %c0_3 = arith.constant 0 : index
    %c0_4 = arith.constant 0 : index
    %2 = vector.load %arg3[%c0_2, %c0_3, %c0_4] : memref<1x64x32xf32, #tpu.memory_space<vmem>>, vector<1x64x32xf32>
    %3 = vector.shape_cast %2 : vector<1x64x32xf32> to vector<64x32xf32>
    %c0_5 = arith.constant 0 : index
    %c0_6 = arith.constant 0 : index
    %4 = vector.load %arg4[%c0_5, %c0_6] : memref<32x32xf32, #tpu.memory_space<vmem>>, vector<32x32xf32>
    %cst = arith.constant dense<0.000000e+00> : vector<32x64xf32>
    %5 = tpu.matmul %4, %1, %cst {dimension_numbers = #tpu.dot_dimension_numbers<[1], [0], [0], [1], [0, 0, 1, 1], [], []>} : vector<32x32xf32>, vector<32x64xf32>, vector<32x64xf32> -> vector<32x64xf32>
    %c0_7 = arith.constant 0 : index
    %c0_8 = arith.constant 0 : index
    %6 = vector.load %arg5[%c0_7, %c0_8] : memref<32x1xf32, #tpu.memory_space<vmem>>, vector<32x1xf32>
    %7 = vector.broadcast %6 : vector<32x1xf32> to vector<32x64xf32>
    %8 = arith.addf %5, %7 : vector<32x64xf32>
    %c0_9 = arith.constant 0 : index
    %c0_10 = arith.constant 0 : index
    %9 = vector.load %arg6[%c0_9, %c0_10] : memref<32x32xf32, #tpu.memory_space<vmem>>, vector<32x32xf32>
    %cst_11 = arith.constant dense<0.000000e+00> : vector<64x32xf32>
    %10 = tpu.matmul %3, %9, %cst_11 {dimension_numbers = #tpu.dot_dimension_numbers<[1], [0], [0], [1], [0, 0, 1, 1], [], []>} : vector<64x32xf32>, vector<32x32xf32>, vector<64x32xf32> -> vector<64x32xf32>
    %c0_12 = arith.constant 0 : index
    %c0_13 = arith.constant 0 : index
    %11 = vector.load %arg7[%c0_12, %c0_13] : memref<1x32xf32, #tpu.memory_space<vmem>>, vector<1x32xf32>
    %12 = vector.broadcast %11 : vector<1x32xf32> to vector<64x32xf32>
    %13 = arith.addf %10, %12 : vector<64x32xf32>
    %c0_14 = arith.constant 0 : index
    %c0_15 = arith.constant 0 : index
    %c0_16 = arith.constant 0 : index
    %14 = vector.load %arg8[%c0_14, %c0_15, %c0_16] : memref<1x32x64xf32, #tpu.memory_space<vmem>>, vector<1x32x64xf32>
    %15 = vector.shape_cast %14 : vector<1x32x64xf32> to vector<32x64xf32>
    %16 = vector.shape_cast %8 : vector<32x64xf32> to vector<1x32x64xf32>
    tpu.vector_store %arg8[%c0_14, %c0_15, %c0_16], %16 {strides = array<i32>} : memref<1x32x64xf32, #tpu.memory_space<vmem>>, vector<1x32x64xf32>,
    %c0_17 = arith.constant 0 : index
    %c0_18 = arith.constant 0 : index
    %c0_19 = arith.constant 0 : index
    %17 = vector.load %arg9[%c0_17, %c0_18, %c0_19] : memref<1x64x32xf32, #tpu.memory_space<vmem>>, vector<1x64x32xf32>
    %18 = vector.shape_cast %17 : vector<1x64x32xf32> to vector<64x32xf32>
    %19 = vector.shape_cast %13 : vector<64x32xf32> to vector<1x64x32xf32>
    tpu.vector_store %arg9[%c0_17, %c0_18, %c0_19], %19 {strides = array<i32>} : memref<1x64x32xf32, #tpu.memory_space<vmem>>, vector<1x64x32xf32>,
    %20 = arith.mulf %13, %13 : vector<64x32xf32>
    %c0_20 = arith.constant 0 : index
    %c0_21 = arith.constant 0 : index
    %c0_22 = arith.constant 0 : index
    %21 = vector.load %arg10[%c0_20, %c0_21, %c0_22] : memref<1x64x32xf32, #tpu.memory_space<vmem>>, vector<1x64x32xf32>
    %22 = vector.shape_cast %21 : vector<1x64x32xf32> to vector<64x32xf32>
    %23 = vector.shape_cast %20 : vector<64x32xf32> to vector<1x64x32xf32>
    tpu.vector_store %arg10[%c0_20, %c0_21, %c0_22], %23 {strides = array<i32>} : memref<1x64x32xf32, #tpu.memory_space<vmem>>, vector<1x64x32xf32>,
    return
  }
  func.func @transform_0(%arg0: i32, %arg1: i32) -> (i32, i32, i32) {
    %c0_i32 = arith.constant 0 : i32
    %c0_i32_0 = arith.constant 0 : i32
    return %arg0, %c0_i32, %arg1 : i32, i32, i32
  }
  func.func @transform_1(%arg0: i32, %arg1: i32) -> (i32, i32, i32) {
    %c0_i32 = arith.constant 0 : i32
    %c0_i32_0 = arith.constant 0 : i32
    return %arg0, %arg1, %c0_i32 : i32, i32, i32
  }
  func.func @transform_2(%arg0: i32, %arg1: i32) -> (i32, i32) {
    %c0_i32 = arith.constant 0 : i32
    %c0_i32_0 = arith.constant 0 : i32
    %c0_i32_1 = arith.constant 0 : i32
    return %c0_i32, %c0_i32_0 : i32, i32
  }
  func.func @transform_3(%arg0: i32, %arg1: i32) -> (i32, i32) {
    %c0_i32 = arith.constant 0 : i32
    %c0_i32_0 = arith.constant 0 : i32
    %c0_i32_1 = arith.constant 0 : i32
    return %c0_i32, %c0_i32_0 : i32, i32
  }
  func.func @transform_4(%arg0: i32, %arg1: i32) -> (i32, i32) {
    %c0_i32 = arith.constant 0 : i32
    %c0_i32_0 = arith.constant 0 : i32
    %c0_i32_1 = arith.constant 0 : i32
    return %c0_i32, %c0_i32_0 : i32, i32
  }
  func.func @transform_5(%arg0: i32, %arg1: i32) -> (i32, i32) {
    %c0_i32 = arith.constant 0 : i32
    %c0_i32_0 = arith.constant 0 : i32
    %c0_i32_1 = arith.constant 0 : i32
    return %c0_i32, %c0_i32_0 : i32, i32
  }
  func.func @transform_6(%arg0: i32, %arg1: i32) -> (i32, i32, i32) {
    %c0_i32 = arith.constant 0 : i32
    %c0_i32_0 = arith.constant 0 : i32
    return %arg0, %c0_i32, %arg1 : i32, i32, i32
  }
  func.func @transform_7(%arg0: i32, %arg1: i32) -> (i32, i32, i32) {
    %c0_i32 = arith.constant 0 : i32
    %c0_i32_0 = arith.constant 0 : i32
    return %arg0, %arg1, %c0_i32 : i32, i32, i32
  }
  func.func @transform_8(%arg0: i32, %arg1: i32) -> (i32, i32, i32) {
    %c0_i32 = arith.constant 0 : i32
    %c0_i32_0 = arith.constant 0 : i32
    return %arg0, %arg1, %c0_i32 : i32, i32, i32
  }
}

</mosaic_0001>

<bundles_post_ra>
// kernel: tpu_custom_call.1
= control target key start
LH: loop header
LB: loop body
LE: loop exit
PB: predicated region body
PF: predicated region fallthrough
CT: control target
= control target key end

     0   :  { %s1474_s0 = inlined_call_operand.vmem [shape: f32[2,32,64], index: 0, kind: input, shape index: {}]   ;;  %s1475_s1 = inlined_call_operand.vmem [shape: f32[2,64,32], index: 1, kind: input, shape index: {}]   ;;  %s1476_s2 = inlined_call_operand.vmem [shape: f32[32,32], index: 2, kind: input, shape index: {}]   ;;  %s1477_s3 = inlined_call_operand.vmem [shape: f32[32,1], index: 3, kind: input, shape index: {}]   ;;  %s1478_s4 = inlined_call_operand.vmem [shape: f32[32,32], index: 4, kind: input, shape index: {}]   ;;  %s1479_s5 = inlined_call_operand.vmem [shape: f32[1,32], index: 5, kind: input, shape index: {}]   ;;  %s1480_s6 = inlined_call_operand.hbm [shape: f32[2,32,64], index: 6, kind: output, shape index: {0}]   ;;  %s1481_s7 = inlined_call_operand.vmem [shape: f32[2,64,32], index: 7, kind: output, shape index: {1}]   ;;  %s1482_s8 = inlined_call_operand.vmem [shape: f32[2,64,32], index: 8, kind: output, shape index: {2}]  }
   0x1   :  { %1483 = sst [smem:[#allocation5_spill]] %s1478_s4 }
   0x2   :  { %14 = vsyncpa [#allocation3], 0 }
   0x3   :  { %16 = vsyncpa [#allocation3 + $0x1], 0  ;;  %s1230_s27 = smov 0   ;;  %s1232_s28 = smov 0  }
   0x4   :  { %s1234_s29 = smov 0   ;;  %s1236_s30 = smov 0  }
   0x5   :  { %s1238_s9 = smov 0   ;;  %s1240_s10 = smov 0  }
   0x6 LB: > { %s930_s11 = sadd.s32 4294967295, %s1179_s10   ;;  %s931_s12 = sadd.s32 4294967294, %s1179_s10   ;;  %s1179_s10 = sphi %s1240_s10, %s22_s10   ;;  %s1175_s9 = sphi %s1238_s9, %s1491_s9   ;;  %s1171_s30 = sphi %s1236_s30, %s1490_s30   ;;  %s1167_s29 = sphi %s1234_s29, %s1489_s29   ;;  %s1163_s28 = sphi %s1232_s28, %s1488_s28   ;;  %s1159_s27 = sphi %s1230_s27, %s1487_s27  }
   0x7   : > { %s34_s13 = sadd.s32 1, %s1175_s9  ;;  %s183_s14 = sadd.s32 1, %s1167_s29 }
   0x8   : > { %p36_p0 = scmp.ge.s32.totalorder %s34_s13, 2  ;;  %p193_p1 = scmp.ne.s32.totalorder %s1167_s29, %s1163_s28 }
   0x9   : > { %p194_p2 = scmp.eq.s32.totalorder %s930_s11, 1  ;;  %p199_p3 = scmp.ne.s32.totalorder %s1163_s28, %s1159_s27 }
   0xa   : > { %s1493_s13 = smov (%p36_p0, %s34_s13), 0  ;;  %p200_p5 = scmp.eq.s32.totalorder %s931_s12, 1 }
   0xb   : > { %p1270_p4 = por %p194_p2, %p193_p1  ;;  %s178_s16 = ssub.s32 %s1175_s9, %s1493_s13 }
   0xc   : > { %p934_p6 = scmp.ge.s32.totalorder %s1179_s10, 1  ;;  %p181_p7 = scmp.eq.s32.totalorder %s178_s16, 0 }
   0xd   : > { %p1277_p8 = por %p200_p5, %p199_p3  ;;  %p310_p9 = scmp.lt.s32.totalorder %s1179_s10, 3 }
   0xe   : > { %s1283_s18 = scalar_select %p181_p7, %s1167_s29, %s183_s14  }
   0xf   : > { %p311_p10 = pnand %p934_p6, %p310_p9 }
  0x10   : > { %p374_p11 = scmp.lt.s32.totalorder (!%p311_p10), %s1171_s30, 1  ;;  %s1486_s4 = sld [smem:[#allocation5_spill]] (!%p311_p10)  ;;  %vm452_vm0 = vcmask (!%p311_p10), 261120   ;;  %v424_v5 = vld [vmem:[%s1476_s2] sm:$0xff] (!%p311_p10)  ;;  %v1181_v6 = vmov (!%p311_p10), 0   ;;  %v430_v9 = vld [vmem:[%s1477_s3 + $0x10] sm:$0xff] (!%p311_p10) }
  0x11   : > { %314 = sbr.rel (%p311_p10) target bundleno = 277 (0x115), region = 44  ;;  %1099 = vset.pattern.permute.xlu0 (!%p311_p10), %v1181_v6  ;;  %1100 = vset.pattern.permute.xlu1 (!%p311_p10), %v1181_v6  ;;  %v428_v8 = vld [vmem:[%s1477_s3] sm:$0xff] (!%p311_p10)  ;;  %v429_v10 = vld [vmem:[%s1477_s3 + $0x8] sm:$0xff] (!%p311_p10)  ;;  %v431_v11 = vld [vmem:[%s1477_s3 + $0x18] sm:$0xff] (!%p311_p10)  ;;  %s349_s21 = sand.u32 (!%p311_p10), 1, %s1163_s28   ;;  %vm690_vm1 = vcmask (!%p311_p10), 523264  }
  0x12   : > { %995 = vmatprep.mubr.msk.f32.mxu0 (!%p311_p10), %vm452_vm0, %v424_v5  ;;  %434 = vperm.xlu0 (!%p311_p10), %1099, %v428_v8   ;;  %v425_v23 = vld [vmem:[%s1476_s2 + $0x8] sm:$0xff] (!%p311_p10)  ;;  %v426_v24 = vld [vmem:[%s1476_s2 + $0x10] sm:$0xff] (!%p311_p10)  ;;  %v427_v26 = vld [vmem:[%s1476_s2 + $0x18] sm:$0xff] (!%p311_p10)  ;;  %s935_s25 = sshll.u32 (!%p311_p10), %s349_s21, 5  ;;  %s966_s11 = sshll.u32 (!%p311_p10), %s1171_s30, 9 }
  0x13   : > { %444 = vperm.xlu1 (!%p311_p10), %1100, %v430_v9   ;;  %v1357_v30 = vld [vmem:[%s1479_s5] ss:$0 sm:$0xff] (!%p311_p10)  ;;  %s1406_s16 = scalar_lea.hbm (!%p311_p10), %s1480_s6, %s966_s11  ;;  %s1419_s19 = scalar_lea.sflag (!%p311_p10), [#allocation3], %s349_s21 }
  0x16   : > { %v550_v0 = vld [vmem:[%s1486_s4] sm:$0xff] (!%p311_p10)  ;;  %v551_v1 = vld [vmem:[%s1486_s4 + $0x8] sm:$0xff] (!%p311_p10)  ;;  %v552_v2 = vld [vmem:[%s1486_s4 + $0x10] sm:$0xff] (!%p311_p10)  ;;  %439 = vperm.xlu0 (!%p311_p10), %1099, %v429_v10  }
  0x17   : > { %v1029_v3 = vpack.c.bf16 (!%p311_p10), %v551_v1, %v550_v0  ;;  %v553_v4 = vld [vmem:[%s1486_s4 + $0x18] sm:$0xff] (!%p311_p10)  ;;  %449 = vperm.xlu1 (!%p311_p10), %1100, %v431_v11  }
  0x18   : > { %s375_s14 = scalar_select %p374_p11, %s1171_s30, 1  ;;  %v1033_v7 = vpack.c.bf16 %v553_v4, %v552_v2 }
  0x19   : > { %1037 = vmatprep.subr.bf16.mxu1 %v1029_v3 }
  0x1a   : > { %s962_s22 = sshll.u32 %s375_s14, 5  ;;  %s1309_s23 = sshll.u32 %s375_s14, 6  ;;  %1039 = vmatpush3.bf16.msra.mxu1 %v1029_v3 }
  0x1b   : > { %s381_s12 = scalar_lea.vmem %s1474_s0, %s962_s22  ;;  %s1321_s4 = scalar_lea.vmem %s1475_s1, %s1309_s23  ;;  %1038 = vmatprep.subr.bf16.mxu1 %v1033_v7 }
  0x1c   : > { %v412_v12 = vld [vmem:[%s381_s12] sm:$0xff]  ;;  %v413_v13 = vld [vmem:[%s381_s12 + $0x8] sm:$0xff]  ;;  %v414_v14 = vld [vmem:[%s381_s12 + $0x10] sm:$0xff]  ;;  %s1363_s20 = scalar_lea.vmem %s1481_s7, %s1309_s23  ;;  %s1371_s24 = scalar_lea.vmem %s1482_s8, %s1309_s23 }
  0x1d   : > { %v1021_v15 = vpack.c.bf16 %v413_v13, %v412_v12  ;;  %v415_v16 = vld [vmem:[%s381_s12 + $0x18] sm:$0xff]  ;;  %v418_v17 = vld [vmem:[%s1321_s4 + $0x10] sm:$0xff]  ;;  %v420_v20 = vld [vmem:[%s1321_s4 + $0x20] sm:$0xff]  ;;  %s351_s23 = scalar_lea.vmem [#allocation2], %s935_s25 }
  0x1e   : > { %v1025_v18 = vpack.c.bf16 %v415_v16, %v414_v14  ;;  %1040 = vmatpush3.bf16.msra.mxu1 %v1033_v7  ;;  %1012 = vmatprep.mubr.msk.f32.mxu1 %vm452_vm0, %v418_v17  ;;  %v419_v19 = vld [vmem:[%s1321_s4 + $0x18] sm:$0xff]  ;;  %v421_v21 = vld [vmem:[%s1321_s4 + $0x28] sm:$0xff]  ;;  %v422_v22 = vld [vmem:[%s1321_s4 + $0x30] sm:$0xff]  ;;  %s752_s26 = sshll.u32 %s351_s23, 4  ;;  %s1399_s26 = int_to_ptr.vmem [resolvable:$true] %s752_s26 }
  0x1f   : > { %1022 = vmatprep.subr.bf16.mxu0 %v1021_v15  ;;  %v423_v25 = vld [vmem:[%s1321_s4 + $0x38] sm:$0xff]  ;;  %v416_v27 = vld [vmem:[%s1321_s4] sm:$0xff]  ;;  %v417_v28 = vld [vmem:[%s1321_s4 + $0x8] sm:$0xff]  ;;  %s1101_s14 = scalar_lea.vmem %s1399_s26, 512  ;;  %s1182_s4 = smov [#allocation2]  }
  0x20   : > { %1024 = vmatpush3.bf16.msra.mxu0 %v1021_v15  ;;  %p1102_p12 = scmp.ne.s32.totalorder %s1399_s26, %s1101_s14  ;;  %s1105_s22 = sshll.u32 %s1182_s4, 4  ;;  %s1106_s22 = int_to_ptr.vmem [resolvable:$false] %s1105_s22 }
  0x21   : > { %1026 = vmatprep.subr.bf16.mxu0 %v1025_v18  ;;  %1013 = vmatmul.mubr.msk.f32.vlgmr.msra.gmra.mrb[0].mxu1 %vm452_vm0, %v419_v19  ;;  %s1107_s25 = scalar_lea.vmem %s1106_s22, 1024  ;;  %p1108_p1 = scmp.lt.s32.totalorder %s1399_s26, %s1106_s22 }
  0x22   : > { %1015 = vmatprep.mubr.msk.f32.mxu1 %vm452_vm0, %v420_v20  ;;  %p1103_p13 = pnand %p1102_p12, %p1270_p4  ;;  %p1109_p2 = scmp.lt.s32.totalorder %s1107_s25, %s1101_s14 }
  0x24   : > { %1028 = vmatpush3.bf16.msra.mxu0 %v1025_v18  ;;  %p1104_p0 = pneg %p1103_p13  ;;  %p1110_p3 = por %p1109_p2, %p1108_p1 }
  0x25   : > { %1030 = vmatprep.subr.bf16.mxu0 %v1029_v3  ;;  %1016 = vmatmul.mubr.msk.f32.gmra.mrb[2].mxu1 %vm452_vm0, %v421_v21 }
  0x26   : > { %1018 = vmatprep.mubr.msk.f32.mxu1 %vm452_vm0, %v422_v22  ;;  %p1111_p5 = pnand %p1110_p3, %p1104_p0 }
  0x27   : > { %996 = vmatmul.mubr.msk.f32.vlgmr.msra.gmra.mrb[0].mxu0 %vm452_vm0, %v425_v23 }
  0x28   : > { %1032 = vmatpush3.bf16.msra.mxu0 %v1029_v3  ;;  %998 = vmatprep.mubr.msk.f32.mxu0 %vm452_vm0, %v426_v24 }
  0x29   : > { %1034 = vmatprep.subr.bf16.mxu0 %v1033_v7  ;;  %1019 = vmatmul.mubr.msk.f32.gmra.mrb[4].mxu1 %vm452_vm0, %v423_v25 }
  0x2b   : > { %999 = vmatmul.mubr.msk.f32.gmra.mrb[2].mxu0 %vm452_vm0, %v427_v26 }
  0x2c   : > { %1036 = vmatpush3.bf16.msra.mxu0 %v1033_v7  ;;  %1009 = vmatprep.mubr.msk.f32.mxu0 %vm452_vm0, %v416_v27 }
  0x2f   : > { %1010 = vmatmul.mubr.msk.f32.vlgmr.msra.gmra.mrb[4].mxu0 %vm452_vm0, %v417_v28 }
  0x91   : > { %v435_v29 = vpop.permute.xlu0 %434 }
  0x92   : > { %v445_v34 = vpop.permute.xlu1 %444 }
  0x95   : > { %v440_v37 = vpop.permute.xlu0 %439 }
  0x96   : > { %v450_v48 = vpop.permute.xlu1 %449 }
  0xf4   : > { %v1014_v31 = vpop.f32.mrb[0].mxu1 }
  0xf5   : > { %v667_v32 = vadd.f32 %v1014_v31, %v1357_v30  ;;  %v661_v33 = vpop.f32.mrb[1].mxu1 }
  0xf6   : > { %v662_v35 = vadd.f32 %v1357_v30, %v661_v33 }
  0xf7   : > { %698 = vst.msk [vmem:[%s1363_s20 + $0x18] sm:$0xff] %vm452_vm0, %v667_v32  ;;  %v706_v36 = vmul.f32 %v667_v32, %v667_v32 }
  0xf8   : > { %697 = vst.msk [vmem:[%s1363_s20 + $0x10] sm:$0xff] %vm452_vm0, %v662_v35  ;;  %v705_v38 = vmul.f32 %v662_v35, %v662_v35  ;;  %v1017_v39 = vpop.f32.mrb[2].mxu1 }
  0xf9   : > { %714 = vst.msk [vmem:[%s1371_s24 + $0x18] sm:$0xff] %vm452_vm0, %v706_v36  ;;  %v677_v40 = vadd.f32 %v1017_v39, %v1357_v30  ;;  %v671_v41 = vpop.f32.mrb[3].mxu1 }
  0xfa   : > { %v997_v42 = vpop.f32.mrb[0].mxu0  ;;  %713 = vst.msk [vmem:[%s1371_s24 + $0x10] sm:$0xff] %vm452_vm0, %v705_v38  ;;  %v672_v43 = vadd.f32 %v1357_v30, %v671_v41 }
  0xfb   : > { %v537_v44 = vadd.f32 %v997_v42, %v440_v37  ;;  %v531_v45 = vpop.f32.mrb[1].mxu0  ;;  %700 = vst.msk [vmem:[%s1363_s20 + $0x28] sm:$0xff] %vm452_vm0, %v677_v40  ;;  %v708_v46 = vmul.f32 %v677_v40, %v677_v40 }
  0xfc   : > { %v532_v47 = vadd.f32 %v531_v45, %v435_v29  ;;  %699 = vst.msk [vmem:[%s1363_s20 + $0x20] sm:$0xff] %vm452_vm0, %v672_v43  ;;  %v707_v49 = vmul.f32 %v672_v43, %v672_v43  ;;  %v1020_v50 = vpop.f32.mrb[4].mxu1 }
  0xfd   : > { %692 = vst.msk [vmem:[%s351_s23 + $0x8] sm:$0xff] %vm690_vm1, %v537_v44  ;;  %v687_v51 = vadd.f32 %v1020_v50, %v1357_v30  ;;  %v681_v52 = vpop.f32.mrb[5].mxu1 }
  0xfe   : > { %716 = vst.msk [vmem:[%s1371_s24 + $0x28] sm:$0xff] %vm452_vm0, %v708_v46  ;;  %v1000_v53 = vpop.f32.mrb[2].mxu0  ;;  %715 = vst.msk [vmem:[%s1371_s24 + $0x20] sm:$0xff] %vm452_vm0, %v707_v49  ;;  %v682_v54 = vadd.f32 %v1357_v30, %v681_v52 }
  0xff   : > { %691 = vst.msk [vmem:[%s351_s23] sm:$0xff] %vm690_vm1, %v532_v47  ;;  %v547_v55 = vadd.f32 %v1000_v53, %v450_v48  ;;  %v541_v56 = vpop.f32.mrb[3].mxu0  ;;  %v710_v57 = vmul.f32 %v687_v51, %v687_v51 }
 0x100   : > { %702 = vst.msk [vmem:[%s1363_s20 + $0x38] sm:$0xff] %vm452_vm0, %v687_v51  ;;  %v542_v58 = vadd.f32 %v541_v56, %v445_v34  ;;  %701 = vst.msk [vmem:[%s1363_s20 + $0x30] sm:$0xff] %vm452_vm0, %v682_v54  ;;  %v709_v59 = vmul.f32 %v682_v54, %v682_v54 }
 0x101   : > { %694 = vst.msk [vmem:[%s351_s23 + $0x18] sm:$0xff] %vm690_vm1, %v547_v55 }
 0x102   : > { %718 = vst.msk [vmem:[%s1371_s24 + $0x38] sm:$0xff] %vm452_vm0, %v710_v57  ;;  %v1011_v60 = vpop.f32.mrb[4].mxu0  ;;  %717 = vst.msk [vmem:[%s1371_s24 + $0x30] sm:$0xff] %vm452_vm0, %v709_v59 }
 0x103   : > { %693 = vst.msk [vmem:[%s351_s23 + $0x10] sm:$0xff] %vm690_vm1, %v542_v58  ;;  %v657_v61 = vadd.f32 %v1011_v60, %v1357_v30  ;;  %v651_v62 = vpop.f32.mrb[5].mxu0 }
 0x104   : > { %1114 = shalt.err (!%p1111_p5)
}
 0x105   : > { %s1115_s21 = scalar_lea.hbm %s1406_s16, 512  ;;  %s1119_s30 = scalar_lea.hbm %s1480_s6, 1024 }
 0x106   : > { %p1116_p6 = scmp.ne.s32.totalorder %s1406_s16, %s1115_s21  ;;  %p1120_p10 = scmp.lt.u32.totalorder %s1406_s16, %s1480_s6 }
 0x107   : > { %p1121_p11 = scmp.lt.u32.totalorder %s1119_s30, %s1115_s21  ;;  %p1123_p13 = scmp.lt.u32.totalorder %s1115_s21, %s1406_s16 }
 0x108   : > { %p1117_p7 = pnand %p1116_p6, %p1270_p4 }
 0x109   : > { %p1122_p12 = por %p1121_p11, %p1120_p10 }
 0x10a   : > { %p1118_p9 = pneg %p1117_p7 }
 0x10b   : > { %p1124_p0 = por %p1123_p13, %p1122_p12 }
 0x10d   : > { %p1125_p1 = pnand %p1124_p0, %p1118_p9 }
 0x10f   : > { %1128 = shalt.err (!%p1125_p1)
}
 0x110   : > { %s1183_s14 = smov 128   ;;  %s1184_s22 = smov 8   ;;  %v652_v63 = vadd.f32 %v1357_v30, %v651_v62  ;;  %696 = vst.msk [vmem:[%s1363_s20 + $0x8] sm:$0xff] %vm452_vm0, %v657_v61  ;;  %v704_v0 = vmul.f32 %v657_v61, %v657_v61 }
 0x111   : > { %1041 = dma.vmem_to_hbm [thread:$0]  (%p1270_p4), %s1399_s26, 512, %s1406_s16, %s1419_s19, %s1183_s14, %s1183_s14, %s1184_s22  }
 0x112   : > { %695 = vst.msk [vmem:[%s1363_s20] sm:$0xff] %vm452_vm0, %v652_v63  ;;  %v703_v1 = vmul.f32 %v652_v63, %v652_v63  ;;  %712 = vst.msk [vmem:[%s1371_s24 + $0x8] sm:$0xff] %vm452_vm0, %v704_v0 }
 0x114   : > { %711 = vst.msk [vmem:[%s1371_s24] sm:$0xff] %vm452_vm0, %v703_v1 }
 0x115 PF: > { %p1047_p2 = scmp.ge.s32.totalorder %s1179_s10, 2  ;;  %s775_s25 = sand.u32 1, %s1159_s27  }
 0x116   : > { %s776_s15 = scalar_lea.sflag [#allocation3], %s775_s25 }
 0x117   : > { %p1044_p4 = pnand %p1047_p2, %p1277_p8 }
 0x119   : > { %1154 = dma.done.wait (!%p1044_p4), %s776_s15, 512  }
 0x11a   : > { %1156 = vsyncadd (!%p1044_p4), %s776_s15, 4294966784  ;;  %s22_s10 = sadd.s32 1, %s1179_s10   ;;  %s1487_s27 = smov %s1163_s28 }
 0x11b   : > { %p19_p3 = scmp.ge.s32.totalorder %s22_s10, 4   ;;  %s1488_s28 = smov %s1167_s29 }
 0x11c   : > { %s1489_s29 = smov %s1283_s18  ;;  %s1490_s30 = smov %s1175_s9 }
 0x11d   : > { %s1491_s9 = smov %s1493_s13  ;;  %21 = sbr.rel (!%p19_p3) target bundleno = 6 (0x6), region = 106 }
 0x124   :  { %805 = vsyncpa [#allocation3], 1 }
 0x125   :  { %807 = vsyncpa [#allocation3 + $0x1], 1 }

</bundles_post_ra>
